<compile_context>
chip_gen: v7x
topology: tpu7x:2x2x1
jax: 0.10.0
libtpu: 0.0.40
codegen_flags: <defaults>
</compile_context>

<pallas_src>
import functools

import jax
import jax.numpy as jnp
from jax.experimental import pallas as pl
from jax.experimental.pallas import tpu as pltpu


_LANE = 128
_SUBLANE = 8
# Budget for resident bf16 weight blocks (w1 tile + w2 tile, incl. buffering).
_WEIGHT_VMEM_BUDGET = 24 << 20


def _round_up(v, m):
    return ((v + m - 1) // m) * m


def _epilogue_dtype():
    """bf16 bias+GELU epilogue only on chips with a bf16 VPU/EUP (v6e / v7x)."""
    try:
        kind = jax.devices()[0].device_kind.lower()
    except Exception:
        return jnp.float32
    if "v6" in kind or "v7" in kind:
        return jnp.bfloat16
    return jnp.float32


# ----------------------------------------------------------------------------
# Fused MLP kernel: one (row-tile, hidden-tile) step of
#     y = gelu(x @ w1 + b1) @ w2 + b2
# ----------------------------------------------------------------------------
def _mlp_kernel(x_ref, w1_ref, b1_ref, w2_ref, b2_ref, o_ref, acc_ref, *,
                epi_dtype):
    hj = pl.program_id(1)

    # fc1: bf16 MXU operands, f32 accumulation.  x cast happens in-kernel.
    h = jnp.dot(x_ref[...].astype(jnp.bfloat16), w1_ref[...],
                preferred_element_type=jnp.float32)
    # Bias + GELU epilogue (bf16 on v6e/v7x, f32 on v5e).
    h = h.astype(epi_dtype) + b1_ref[...].astype(epi_dtype)
    h = jax.nn.gelu(h, approximate=True)

    # fc2 partial product for this hidden tile.
    part = jnp.dot(h.astype(jnp.bfloat16), w2_ref[...],
                   preferred_element_type=jnp.float32)

    @pl.when(hj == 0)
    def _():
        acc_ref[...] = part

    @pl.when(hj > 0)
    def _():
        acc_ref[...] += part

    # nn.Dropout(p=0.0) is the identity (train and eval) -> nothing to do.
    @pl.when(hj == pl.num_programs(1) - 1)
    def _():
        o_ref[...] = (acc_ref[...] + b2_ref[...]).astype(o_ref.dtype)


def _choose_tiles(m, k, h, n):
    """Row tile (multiple of 8, <=256) and hidden tile (multiple of 128)."""
    tm = min(_round_up(max(m, 1), _SUBLANE), 256)

    def weight_bytes(th, bufs):
        return bufs * 2 * (k * th + th * n)          # bf16 weight blocks

    if weight_bytes(h, 1) <= _WEIGHT_VMEM_BUDGET or h % _LANE != 0:
        # Fully resident weights (single hidden tile, single-buffered).
        # TODO(synk): pad/mask ragged hidden tiles for non-128-multiple hidden.
        th = h
    else:
        th = h
        for cand in (2048, 1024, 512, 256, 128):
            if cand < h and h % cand == 0 and \
                    weight_bytes(cand, 2) <= _WEIGHT_VMEM_BUDGET:
                th = cand
                break
    return tm, th


def pallas_mlp(x, w1, b1, w2, b2, *, hidden_block=None):
    """Mlp forward.  x: (..., in); w1: (in, hidden); w2: (hidden, out)."""
    orig_shape = x.shape
    k = orig_shape[-1]
    h = w1.shape[1]
    n = w2.shape[1]

    x2d = x.reshape(-1, k)
    m = x2d.shape[0]

    tm, th = _choose_tiles(m, k, h, n)
    if hidden_block is not None:
        th = hidden_block
    assert h % th == 0, "hidden tile must divide hidden_features"

    nr = pl.cdiv(m, tm)
    nh = h // th
    one_h = (nh == 1)

    mp = nr * tm
    if mp != m:                                        # single pad at the edge
        x2d = jnp.pad(x2d, ((0, mp - m), (0, 0)))

    # Weights go to the MXU in bf16.  This cast is a trace-time no-op when the
    # caller already stores the params in bf16 (preferred: cast once at init).
    w1b = w1 if w1.dtype == jnp.bfloat16 else w1.astype(jnp.bfloat16)
    w2b = w2 if w2.dtype == jnp.bfloat16 else w2.astype(jnp.bfloat16)
    b1f = b1.reshape(1, h).astype(jnp.float32)
    b2f = b2.reshape(1, n).astype(jnp.float32)

    def spec(shape, index_map, single_buffer=False):
        if single_buffer:   # constant block index -> one buffer is enough
            return pl.BlockSpec(shape, index_map, pipeline_mode=pl.Buffered(1))
        return pl.BlockSpec(shape, index_map)

    # VMEM accounting for an explicit (generous) limit.
    wbuf = 1 if one_h else 2
    vmem_needed = (
        2 * tm * k * x2d.dtype.itemsize                 # x double buffer
        + wbuf * (k * th * 2 + th * 4 + th * n * 2)     # w1 / b1 / w2 blocks
        + n * 4                                         # b2 (single buffer)
        + 2 * tm * n * 4                                # output double buffer
        + tm * n * 4                                    # f32 accumulator
        + tm * th * 6                                   # hidden intermediate
    )
    vmem_limit = max(min(int(vmem_needed * 1.5) + (4 << 20), 56 << 20),
                     16 << 20)

    cost = pl.CostEstimate(
        flops=2 * mp * k * h + 2 * mp * h * n,
        transcendentals=mp * h,
        bytes_accessed=(mp * k * x2d.dtype.itemsize + k * h * 2 + h * 4
                        + h * n * 2 + n * 4 + mp * n * 4),
    )

    out = pl.pallas_call(
        functools.partial(_mlp_kernel, epi_dtype=_epilogue_dtype()),
        out_shape=jax.ShapeDtypeStruct((mp, n), jnp.float32),
        grid=(nr, nh),
        in_specs=[
            spec((tm, k), lambda i, j: (i, 0)),                       # x rows
            spec((k, th), lambda i, j: (0, j), single_buffer=one_h),  # w1
            spec((1, th), lambda i, j: (0, j), single_buffer=one_h),  # b1
            spec((th, n), lambda i, j: (j, 0), single_buffer=one_h),  # w2
            spec((1, n), lambda i, j: (0, 0), single_buffer=True),    # b2
        ],
        out_specs=pl.BlockSpec((tm, n), lambda i, j: (i, 0)),
        scratch_shapes=[pltpu.VMEM((tm, n), jnp.float32)],
        compiler_params=pltpu.CompilerParams(
            dimension_semantics=("parallel", "arbitrary"),
            vmem_limit_bytes=vmem_limit),
        cost_estimate=cost,
    )(x2d, w1b, b1f, w2b, b2f)

    if mp != m:
        out = out[:m]
    return out.reshape(*orig_shape[:-1], n)


# ----------------------------------------------------------------------------
if __name__ == "__main__":
    key = jax.random.PRNGKey(0)
    kx, k1, kb1, k2, kb2 = jax.random.split(key, 5)

    # Small shapes consistent with the module's typical ViT-block usage:
    #   tokens (B=2, N=16), in_features=out_features=128, hidden=4*128=512.
    B, S, C, H = 2, 16, 128, 512
    x = jax.random.normal(kx, (B, S, C), jnp.float32)
    fc1_w = 0.02 * jax.random.normal(k1, (C, H), jnp.float32)
    fc1_b = 0.02 * jax.random.normal(kb1, (H,), jnp.float32)
    fc2_w = 0.02 * jax.random.normal(k2, (H, C), jnp.float32)
    fc2_b = 0.02 * jax.random.normal(kb2, (C,), jnp.float32)

    # Init-time cast of the matmul weights to bf16 (hoisted out of the hot path).
    fc1_wb = fc1_w.astype(jnp.bfloat16)
    fc2_wb = fc2_w.astype(jnp.bfloat16)

    # Pure-JAX reference (same tanh-GELU); deltas come from bf16 MXU operands.
    ref = jax.nn.gelu(x @ fc1_w + fc1_b, approximate=True) @ fc2_w + fc2_b

    fwd = jax.jit(pallas_mlp, static_argnames=("hidden_block",))

    # 1) Fully-resident weights: single hidden tile, single-buffered w1/w2.
    y = fwd(x, fc1_wb, fc1_b, fc2_wb, fc2_b)
    jax.block_until_ready(y)
    assert y.shape == ref.shape == (B, S, C)
    err = float(jnp.max(jnp.abs(y - ref)))
    assert err < 3e-2, f"max abs err (fused path) {err}"

    # 2) Hidden-dim tiled path (the 'arbitrary' reduction axis + f32 VMEM
    #    accumulator used for large hidden sizes), forced here for coverage.
    y2 = fwd(x, fc1_wb, fc1_b, fc2_wb, fc2_b, hidden_block=256)
    jax.block_until_ready(y2)
    err2 = float(jnp.max(jnp.abs(y2 - ref)))
    assert err2 < 3e-2, f"max abs err (hidden-tiled path) {err2}"

    print("KERNEL_OK")
</pallas_src>

<mosaic_0001>
module attributes {stable_mosaic.version = 11 : i64} {
  func.func @_mlp_kernel(%arg0: i32, %arg1: i32, %arg2: memref<32x128xf32, #tpu.memory_space<vmem>>, %arg3: memref<128x512xbf16, #tpu.memory_space<vmem>>, %arg4: memref<1x512xf32, #tpu.memory_space<vmem>>, %arg5: memref<512x128xbf16, #tpu.memory_space<vmem>>, %arg6: memref<1x128xf32, #tpu.memory_space<vmem>>, %arg7: memref<32x128xf32, #tpu.memory_space<vmem>>, %arg8: memref<32x128xf32, #tpu.memory_space<vmem>>) attributes {dimension_semantics = [#tpu.dimension_semantics<parallel>, #tpu.dimension_semantics<arbitrary>], iteration_bounds = array<i64: 1, 1>, scalar_prefetch = 0 : i64, scratch_operands = 1 : i64, tpu.core_type = #tpu.core_type<tc>, window_params = [{transform_indices = @transform_0, window_bounds = array<i64: 32, 128>}, {pipeline_mode = #tpu.pipeline_mode<synchronous>, transform_indices = @transform_1, window_bounds = array<i64: 128, 512>}, {pipeline_mode = #tpu.pipeline_mode<synchronous>, transform_indices = @transform_2, window_bounds = array<i64: 1, 512>}, {pipeline_mode = #tpu.pipeline_mode<synchronous>, transform_indices = @transform_3, window_bounds = array<i64: 512, 128>}, {pipeline_mode = #tpu.pipeline_mode<synchronous>, transform_indices = @transform_4, window_bounds = array<i64: 1, 128>}, {transform_indices = @transform_5, window_bounds = array<i64: 32, 128>}]} {
    %c0 = arith.constant 0 : index
    %c0_0 = arith.constant 0 : index
    %0 = vector.load %arg2[%c0, %c0_0] : memref<32x128xf32, #tpu.memory_space<vmem>>, vector<32x128xf32>
    %1 = arith.truncf %0 : vector<32x128xf32> to vector<32x128xbf16>
    %c0_1 = arith.constant 0 : index
    %c0_2 = arith.constant 0 : index
    %2 = vector.load %arg3[%c0_1, %c0_2] : memref<128x512xbf16, #tpu.memory_space<vmem>>, vector<128x512xbf16>
    %cst = arith.constant dense<0.000000e+00> : vector<32x512xf32>
    %3 = tpu.matmul %1, %2, %cst {dimension_numbers = #tpu.dot_dimension_numbers<[1], [0], [0], [1], [0, 0, 1, 1], [], []>} : vector<32x128xbf16>, vector<128x512xbf16>, vector<32x512xf32> -> vector<32x512xf32>
    %c0_3 = arith.constant 0 : index
    %c0_4 = arith.constant 0 : index
    %4 = vector.load %arg4[%c0_3, %c0_4] : memref<1x512xf32, #tpu.memory_space<vmem>>, vector<1x512xf32>
    %5 = vector.broadcast %4 : vector<1x512xf32> to vector<32x512xf32>
    %6 = arith.addf %3, %5 : vector<32x512xf32>
    %7 = arith.mulf %6, %6 : vector<32x512xf32>
    %8 = arith.mulf %6, %7 : vector<32x512xf32>
    %cst_5 = arith.constant 4.471500e-02 : f32
    %9 = vector.broadcast %cst_5 : f32 to vector<32x512xf32>
    %10 = arith.mulf %9, %8 : vector<32x512xf32>
    %11 = arith.addf %6, %10 : vector<32x512xf32>
    %cst_6 = arith.constant 0.797884583 : f32
    %12 = vector.broadcast %cst_6 : f32 to vector<32x512xf32>
    %13 = arith.mulf %12, %11 : vector<32x512xf32>
    %14 = math.tanh %13 : vector<32x512xf32>
    %cst_7 = arith.constant 1.000000e+00 : f32
    %15 = vector.broadcast %cst_7 : f32 to vector<32x512xf32>
    %16 = arith.addf %15, %14 : vector<32x512xf32>
    %cst_8 = arith.constant 5.000000e-01 : f32
    %17 = vector.broadcast %cst_8 : f32 to vector<32x512xf32>
    %18 = arith.mulf %17, %16 : vector<32x512xf32>
    %19 = arith.mulf %6, %18 : vector<32x512xf32>
    %20 = arith.truncf %19 : vector<32x512xf32> to vector<32x512xbf16>
    %c0_9 = arith.constant 0 : index
    %c0_10 = arith.constant 0 : index
    %21 = vector.load %arg5[%c0_9, %c0_10] : memref<512x128xbf16, #tpu.memory_space<vmem>>, vector<512x128xbf16>
    %cst_11 = arith.constant dense<0.000000e+00> : vector<32x128xf32>
    %22 = tpu.matmul %20, %21, %cst_11 {dimension_numbers = #tpu.dot_dimension_numbers<[1], [0], [0], [1], [0, 0, 1, 1], [], []>} : vector<32x512xbf16>, vector<512x128xbf16>, vector<32x128xf32> -> vector<32x128xf32>
    %c0_i32 = arith.constant 0 : i32
    %23 = arith.cmpi eq, %arg1, %c0_i32 : i32
    %24 = arith.extui %23 : i1 to i32
    %c0_i32_12 = arith.constant 0 : i32
    %25 = arith.cmpi ne, %24, %c0_i32_12 : i32
    scf.if %25 {
      %c0_17 = arith.constant 0 : index
      %c0_18 = arith.constant 0 : index
      %32 = vector.load %arg8[%c0_17, %c0_18] : memref<32x128xf32, #tpu.memory_space<vmem>>, vector<32x128xf32>
      tpu.vector_store %arg8[%c0_17, %c0_18], %22 {strides = array<i32>} : memref<32x128xf32, #tpu.memory_space<vmem>>, vector<32x128xf32>,
    } else {
    }
    %c0_i32_13 = arith.constant 0 : i32
    %26 = arith.cmpi sgt, %arg1, %c0_i32_13 : i32
    %27 = arith.extui %26 : i1 to i32
    %c0_i32_14 = arith.constant 0 : i32
    %28 = arith.cmpi ne, %27, %c0_i32_14 : i32
    scf.if %28 {
      %c0_17 = arith.constant 0 : index
      %c0_18 = arith.constant 0 : index
      %32 = vector.load %arg8[%c0_17, %c0_18] : memref<32x128xf32, #tpu.memory_space<vmem>>, vector<32x128xf32>
      %33 = arith.addf %32, %22 : vector<32x128xf32>
      %c0_19 = arith.constant 0 : index
      %c0_20 = arith.constant 0 : index
      %34 = vector.load %arg8[%c0_19, %c0_20] : memref<32x128xf32, #tpu.memory_space<vmem>>, vector<32x128xf32>
      tpu.vector_store %arg8[%c0_19, %c0_20], %33 {strides = array<i32>} : memref<32x128xf32, #tpu.memory_space<vmem>>, vector<32x128xf32>,
    } else {
    }
    %c0_i32_15 = arith.constant 0 : i32
    %29 = arith.cmpi eq, %arg1, %c0_i32_15 : i32
    %30 = arith.extui %29 : i1 to i32
    %c0_i32_16 = arith.constant 0 : i32
    %31 = arith.cmpi ne, %30, %c0_i32_16 : i32
    scf.if %31 {
      %c0_17 = arith.constant 0 : index
      %c0_18 = arith.constant 0 : index
      %32 = vector.load %arg8[%c0_17, %c0_18] : memref<32x128xf32, #tpu.memory_space<vmem>>, vector<32x128xf32>
      %c0_19 = arith.constant 0 : index
      %c0_20 = arith.constant 0 : index
      %33 = vector.load %arg6[%c0_19, %c0_20] : memref<1x128xf32, #tpu.memory_space<vmem>>, vector<1x128xf32>
      %34 = vector.broadcast %33 : vector<1x128xf32> to vector<32x128xf32>
      %35 = arith.addf %32, %34 : vector<32x128xf32>
      %c0_21 = arith.constant 0 : index
      %c0_22 = arith.constant 0 : index
      %36 = vector.load %arg7[%c0_21, %c0_22] : memref<32x128xf32, #tpu.memory_space<vmem>>, vector<32x128xf32>
      tpu.vector_store %arg7[%c0_21, %c0_22], %35 {strides = array<i32>} : memref<32x128xf32, #tpu.memory_space<vmem>>, vector<32x128xf32>,
    } else {
    }
    return
  }
  func.func @transform_0(%arg0: i32, %arg1: i32) -> (i32, i32) {
    %c0_i32 = arith.constant 0 : i32
    %c0_i32_0 = arith.constant 0 : i32
    return %arg0, %c0_i32 : i32, i32
  }
  func.func @transform_1(%arg0: i32, %arg1: i32) -> (i32, i32) {
    %c0_i32 = arith.constant 0 : i32
    %c0_i32_0 = arith.constant 0 : i32
    return %c0_i32, %arg1 : i32, i32
  }
  func.func @transform_2(%arg0: i32, %arg1: i32) -> (i32, i32) {
    %c0_i32 = arith.constant 0 : i32
    %c0_i32_0 = arith.constant 0 : i32
    return %c0_i32, %arg1 : i32, i32
  }
  func.func @transform_3(%arg0: i32, %arg1: i32) -> (i32, i32) {
    %c0_i32 = arith.constant 0 : i32
    %c0_i32_0 = arith.constant 0 : i32
    return %arg1, %c0_i32 : i32, i32
  }
  func.func @transform_4(%arg0: i32, %arg1: i32) -> (i32, i32) {
    %c0_i32 = arith.constant 0 : i32
    %c0_i32_0 = arith.constant 0 : i32
    %c0_i32_1 = arith.constant 0 : i32
    return %c0_i32, %c0_i32_0 : i32, i32
  }
  func.func @transform_5(%arg0: i32, %arg1: i32) -> (i32, i32) {
    %c0_i32 = arith.constant 0 : i32
    %c0_i32_0 = arith.constant 0 : i32
    return %arg0, %c0_i32 : i32, i32
  }
}

</mosaic_0001>

<bundles_post_ra>
// kernel: pallas_mlp.1
= control target key start
LH: loop header
LB: loop body
LE: loop exit
PB: predicated region body
PF: predicated region fallthrough
CT: control target
= control target key end

     0   :  { %10 = vsyncpa [#allocation4], 0  ;;  %s1538_s0 = inlined_call_operand.hbm [shape: f32[32,128], index: 0, kind: input, shape index: {}]   ;;  %s1539_s1 = inlined_call_operand.hbm [shape: bf16[128,512], index: 1, kind: input, shape index: {}]   ;;  %s1540_s2 = inlined_call_operand.vmem [shape: f32[1,512], index: 2, kind: input, shape index: {}]   ;;  %s1541_s3 = inlined_call_operand.hbm [shape: bf16[512,128], index: 3, kind: input, shape index: {}]   ;;  %s1542_s4 = inlined_call_operand.vmem [shape: f32[1,128], index: 4, kind: input, shape index: {}]   ;;  %s1543_s5 = inlined_call_operand.hbm [shape: f32[32,128], index: 5, kind: output, shape index: {}]  }
   0x1   :  { %11 = vsyncpa [#allocation7], 0 }
   0x2   :  { %12 = vsyncpa [#allocation5], 0  ;;  %s1297_s18 = smov [#allocation6]   ;;  %s1203_s22 = scalar_lea.hbm %s1539_s1, 4096 }
   0x3   :  { %s30_s19 = sshll.u32 %s1297_s18, 4  ;;  %p1204_p0 = scmp.ne.s32.totalorder %s1539_s1, %s1203_s22  ;;  %s31_s19 = int_to_ptr.vmem [resolvable:$true] %s30_s19 }
   0x4   :  { %p1207_p1 = scmp.lt.u32.totalorder %s1203_s22, %s1539_s1 }
   0x6   :  { %p1209_p2 = pnand %p1207_p1, %p1204_p0 }
   0x8   :  { %1212 = shalt.err (!%p1209_p2)
}
   0x9   :  { %s1213_s27 = scalar_lea.vmem %s31_s19, 4096  ;;  %p1218_p4 = scmp.lt.s32.totalorder %s31_s19, %s31_s19 }
   0xa   :  { %p1214_p3 = scmp.ne.s32.totalorder %s31_s19, %s1213_s27  ;;  %p1219_p5 = scmp.lt.s32.totalorder %s1213_s27, %s1213_s27 }
   0xc   :  { %p1220_p6 = por %p1219_p5, %p1218_p4 }
   0xe   :  { %p1221_p7 = pnand %p1220_p6, %p1214_p3 }
  0x10   :  { %1224 = shalt.err (!%p1221_p7)
}
  0x11   :  { %s1298_s28 = smov 256   ;;  %s1299_s29 = smov 16  }
  0x12   :  { %36 = dma.hbm_to_vmem [thread:$0]  %s1539_s1, 4096, %s31_s19, [#allocation7], %s1298_s28, %s1298_s28, %s1299_s29  }
  0x13   :  { %s1300_s7 = smov [#allocation3]   ;;  %s1225_s11 = scalar_lea.hbm %s1538_s0, 512 }
  0x14   :  { %s18_s8 = sshll.u32 %s1300_s7, 4  ;;  %p1226_p8 = scmp.ne.s32.totalorder %s1538_s0, %s1225_s11  ;;  %s19_s8 = int_to_ptr.vmem [resolvable:$true] %s18_s8 }
  0x15   :  { %p1229_p9 = scmp.lt.u32.totalorder %s1225_s11, %s1538_s0 }
  0x17   :  { %p1231_p10 = pnand %p1229_p9, %p1226_p8 }
  0x19   :  { %1234 = shalt.err (!%p1231_p10)
}
  0x1a   :  { %s1235_s16 = scalar_lea.vmem %s19_s8, 512  ;;  %p1240_p12 = scmp.lt.s32.totalorder %s19_s8, %s19_s8 }
  0x1b   :  { %p1236_p11 = scmp.ne.s32.totalorder %s19_s8, %s1235_s16  ;;  %p1241_p13 = scmp.lt.s32.totalorder %s1235_s16, %s1235_s16 }
  0x1d   :  { %p1242_p0 = por %p1241_p13, %p1240_p12 }
  0x1f   :  { %p1243_p1 = pnand %p1242_p0, %p1236_p11 }
  0x21   :  { %1246 = shalt.err (!%p1243_p1)
}
  0x22   :  { %s1301_s1 = smov 128   ;;  %s1302_s17 = smov 8  }
  0x23   :  { %24 = dma.hbm_to_vmem [thread:$0]  %s1538_s0, 512, %s19_s8, [#allocation4], %s1301_s1, %s1301_s1, %s1302_s17  }
  0x24   :  { %s1303_s20 = smov [#allocation8]   ;;  %s1247_s24 = scalar_lea.hbm %s1541_s3, 4096 }
  0x25   :  { %s44_s21 = sshll.u32 %s1303_s20, 4  ;;  %p1248_p2 = scmp.ne.s32.totalorder %s1541_s3, %s1247_s24  ;;  %s45_s21 = int_to_ptr.vmem [resolvable:$true] %s44_s21 }
  0x26   :  { %p1251_p3 = scmp.lt.u32.totalorder %s1247_s24, %s1541_s3 }
  0x28   :  { %p1253_p4 = pnand %p1251_p3, %p1248_p2 }
  0x2a   :  { %1256 = shalt.err (!%p1253_p4)
}
  0x2b   :  { %s1257_s29 = scalar_lea.vmem %s45_s21, 4096  ;;  %p1262_p6 = scmp.lt.s32.totalorder %s45_s21, %s45_s21 }
  0x2c   :  { %p1258_p5 = scmp.ne.s32.totalorder %s45_s21, %s1257_s29  ;;  %p1263_p7 = scmp.lt.s32.totalorder %s1257_s29, %s1257_s29 }
  0x2e   :  { %p1264_p8 = por %p1263_p7, %p1262_p6 }
  0x30   :  { %p1265_p9 = pnand %p1264_p8, %p1258_p5 }
  0x32   :  { %1268 = shalt.err (!%p1265_p9)
}
  0x33   :  { %s1304_s0 = smov 64   ;;  %s1305_s30 = smov 4  }
  0x34   :  { %50 = dma.hbm_to_vmem [thread:$0]  %s1541_s3, 4096, %s45_s21, [#allocation7], %s1304_s0, %s1304_s0, %s1305_s30  }
  0x35   :  { %1291 = dma.done.wait [#allocation4], 512  }
  0x36   :  { %1292 = vsyncadd [#allocation4], 4294966784 }
  0x37   :  { %1293 = dma.done.wait [#allocation7], 8192  }
  0x38   :  { %1294 = vsyncadd [#allocation7], 4294959104  ;;  %v1306_v0 = vmov 0   ;;  %v1091_v1 = vld [vmem:[#allocation6 + $0x4] ss:$16 sps:$4 sm:$0xff]   ;;  %v64_v34 = vld [vmem:[#allocation3 + $0x8] sm:$0xff] }
  0x39   :  { %315 = vmatprep.mubr.bf16.mxu0 %v1306_v0  ;;  %368 = vmatprep.mubr.bf16.mxu1 %v1306_v0  ;;  %v1093_v2 = vld [vmem:[#allocation6 + $0xc] ss:$16 sps:$4 sm:$0xff]   ;;  %v1095_v3 = vld [vmem:[#allocation6] ss:$16 sps:$4 sm:$0xff]   ;;  %v1096_v4 = vld [vmem:[#allocation6 + $0x8] ss:$16 sps:$4 sm:$0xff]  }
  0x3a   :  { %283 = vmatprep.subr.bf16.mxu0 %v1091_v1  ;;  %336 = vmatprep.subr.bf16.mxu1 %v1093_v2  ;;  %v1097_v5 = vld [vmem:[#allocation6 + $0x24] ss:$16 sps:$4 sm:$0xff]   ;;  %v1099_v6 = vld [vmem:[#allocation6 + $0x2c] ss:$16 sps:$4 sm:$0xff]   ;;  %v1101_v7 = vld [vmem:[#allocation6 + $0x20] ss:$16 sps:$4 sm:$0xff]  }
  0x3b   :  { %284 = vmatpush1.bf16.msra.mxu0 %v1095_v3  ;;  %337 = vmatpush1.bf16.msra.mxu1 %v1096_v4  ;;  %v1102_v8 = vld [vmem:[#allocation6 + $0x28] ss:$16 sps:$4 sm:$0xff]   ;;  %v1103_v9 = vld [vmem:[#allocation6 + $0x44] ss:$16 sps:$4 sm:$0xff]   ;;  %v1105_v10 = vld [vmem:[#allocation6 + $0x4c] ss:$16 sps:$4 sm:$0xff]  }
  0x3c   :  { %285 = vmatprep.subr.bf16.mxu0 %v1097_v5  ;;  %338 = vmatprep.subr.bf16.mxu1 %v1099_v6  ;;  %v1107_v11 = vld [vmem:[#allocation6 + $0x40] ss:$16 sps:$4 sm:$0xff]   ;;  %v1108_v12 = vld [vmem:[#allocation6 + $0x48] ss:$16 sps:$4 sm:$0xff]   ;;  %v1109_v13 = vld [vmem:[#allocation6 + $0x64] ss:$16 sps:$4 sm:$0xff]  }
  0x3d   :  { %v1111_v14 = vld [vmem:[#allocation6 + $0x6c] ss:$16 sps:$4 sm:$0xff]   ;;  %v1113_v15 = vld [vmem:[#allocation6 + $0x60] ss:$16 sps:$4 sm:$0xff]   ;;  %v1114_v16 = vld [vmem:[#allocation6 + $0x68] ss:$16 sps:$4 sm:$0xff]  }
  0x3e   :  { %v1115_v17 = vld [vmem:[#allocation6 + $0x84] ss:$16 sps:$4 sm:$0xff]   ;;  %v1117_v18 = vld [vmem:[#allocation6 + $0x8c] ss:$16 sps:$4 sm:$0xff]   ;;  %v1119_v19 = vld [vmem:[#allocation6 + $0x80] ss:$16 sps:$4 sm:$0xff]  }
  0x3f   :  { %286 = vmatpush1.bf16.msra.mxu0 %v1101_v7  ;;  %339 = vmatpush1.bf16.msra.mxu1 %v1102_v8  ;;  %v1120_v20 = vld [vmem:[#allocation6 + $0x88] ss:$16 sps:$4 sm:$0xff]   ;;  %v1121_v21 = vld [vmem:[#allocation6 + $0xa4] ss:$16 sps:$4 sm:$0xff]   ;;  %v1123_v22 = vld [vmem:[#allocation6 + $0xac] ss:$16 sps:$4 sm:$0xff]   ;;  %v103_v7 = vlaneseq }
  0x40   :  { %287 = vmatprep.subr.bf16.mxu0 %v1103_v9  ;;  %340 = vmatprep.subr.bf16.mxu1 %v1105_v10  ;;  %v1125_v23 = vld [vmem:[#allocation6 + $0xa0] ss:$16 sps:$4 sm:$0xff]   ;;  %v1126_v24 = vld [vmem:[#allocation6 + $0xa8] ss:$16 sps:$4 sm:$0xff]   ;;  %v1127_v25 = vld [vmem:[#allocation6 + $0xc4] ss:$16 sps:$4 sm:$0xff]  }
  0x41   :  { %v1129_v26 = vld [vmem:[#allocation6 + $0xcc] ss:$16 sps:$4 sm:$0xff]   ;;  %v1131_v27 = vld [vmem:[#allocation6 + $0xc0] ss:$16 sps:$4 sm:$0xff]   ;;  %v1132_v28 = vld [vmem:[#allocation6 + $0xc8] ss:$16 sps:$4 sm:$0xff]  }
  0x42   :  { %v1133_v29 = vld [vmem:[#allocation6 + $0xe4] ss:$16 sps:$4 sm:$0xff]   ;;  %v1135_v30 = vld [vmem:[#allocation6 + $0xec] ss:$16 sps:$4 sm:$0xff]   ;;  %v1137_v31 = vld [vmem:[#allocation6 + $0xe0] ss:$16 sps:$4 sm:$0xff]  }
  0x43   :  { %288 = vmatpush1.bf16.msra.mxu0 %v1107_v11  ;;  %341 = vmatpush1.bf16.msra.mxu1 %v1108_v12  ;;  %v1138_v32 = vld [vmem:[#allocation6 + $0xe8] ss:$16 sps:$4 sm:$0xff]   ;;  %v63_v33 = vld [vmem:[#allocation3] sm:$0xff]  ;;  %v65_v36 = vld [vmem:[#allocation3 + $0x10] sm:$0xff]  ;;  %v104_v8 = vshrl.u32 %v103_v7, 7 }
  0x44   :  { %289 = vmatprep.subr.bf16.mxu0 %v1109_v13  ;;  %342 = vmatprep.subr.bf16.mxu1 %v1111_v14  ;;  %v67_v35 = vpack.c.bf16 %v64_v34, %v63_v33  ;;  %v66_v37 = vld [vmem:[#allocation3 + $0x18] sm:$0xff]  ;;  %v1139_v39 = vld [vmem:[#allocation8 + $0x40] sm:$0xff]   ;;  %v1143_v43 = vld [vmem:[#allocation8 + $0x48] sm:$0xff]  }
  0x45   :  { %v68_v38 = vpack.c.bf16 %v66_v37, %v65_v36  ;;  %v1140_v40 = vld [vmem:[#allocation8 + $0xc0] sm:$0xff]   ;;  %v1144_v44 = vld [vmem:[#allocation8 + $0xc8] sm:$0xff]   ;;  %v1147_v47 = vld [vmem:[#allocation8 + $0x50] sm:$0xff]   ;;  %v105_v9 = vsub.s32 0, %v104_v8  ;;  %v113_v10 = vsub.s32 2, %v104_v8  ;;  %v109_v12 = vsub.s32 1, %v104_v8 }
  0x46   :  { %v1141_v41 = vld [vmem:[#allocation8] sm:$0xff]   ;;  %v1145_v45 = vld [vmem:[#allocation8 + $0x8] sm:$0xff]   ;;  %v1148_v48 = vld [vmem:[#allocation8 + $0xd0] sm:$0xff]   ;;  %v117_v13 = vsub.s32 3, %v104_v8 }
  0x47   :  { %290 = vmatpush1.bf16.msra.mxu0 %v1113_v15  ;;  %343 = vmatpush1.bf16.msra.mxu1 %v1114_v16  ;;  %v1142_v42 = vld [vmem:[#allocation8 + $0x80] sm:$0xff]   ;;  %v1146_v46 = vld [vmem:[#allocation8 + $0x88] sm:$0xff]   ;;  %v1149_v49 = vld [vmem:[#allocation8 + $0x10] sm:$0xff]  }
  0x48   :  { %291 = vmatprep.subr.bf16.mxu0 %v1115_v17  ;;  %344 = vmatprep.subr.bf16.mxu1 %v1117_v18  ;;  %v1150_v50 = vld [vmem:[#allocation8 + $0x90] sm:$0xff]   ;;  %v1151_v51 = vld [vmem:[#allocation8 + $0x58] sm:$0xff]   ;;  %v1155_v55 = vld [vmem:[#allocation8 + $0x60] sm:$0xff]  }
  0x49   :  { %v1152_v52 = vld [vmem:[#allocation8 + $0xd8] sm:$0xff]   ;;  %v1156_v56 = vld [vmem:[#allocation8 + $0xe0] sm:$0xff]   ;;  %v1159_v59 = vld [vmem:[#allocation8 + $0x68] sm:$0xff]  }
  0x4a   :  { %v1153_v53 = vld [vmem:[#allocation8 + $0x18] sm:$0xff]   ;;  %v1157_v57 = vld [vmem:[#allocation8 + $0x20] sm:$0xff]   ;;  %v1160_v60 = vld [vmem:[#allocation8 + $0xe8] sm:$0xff]  }
  0x4b   :  { %292 = vmatpush1.bf16.msra.mxu0 %v1119_v19  ;;  %345 = vmatpush1.bf16.msra.mxu1 %v1120_v20  ;;  %v1154_v54 = vld [vmem:[#allocation8 + $0x98] sm:$0xff]   ;;  %v1158_v58 = vld [vmem:[#allocation8 + $0xa0] sm:$0xff]   ;;  %v1161_v61 = vld [vmem:[#allocation8 + $0x28] sm:$0xff]  }
  0x4c   :  { %293 = vmatprep.subr.bf16.mxu0 %v1121_v21  ;;  %346 = vmatprep.subr.bf16.mxu1 %v1123_v22  ;;  %v1162_v62 = vld [vmem:[#allocation8 + $0xa8] sm:$0xff]   ;;  %v1163_v63 = vld [vmem:[#allocation8 + $0x70] sm:$0xff]   ;;  %v1167_v3 = vld [vmem:[#allocation8 + $0x78] sm:$0xff]  }
  0x4d   :  { %v1165_v1 = vld [vmem:[#allocation8 + $0x30] sm:$0xff]   ;;  %v1168_v4 = vld [vmem:[#allocation8 + $0xf8] sm:$0xff]   ;;  %v101_v11 = vld [vmem:[%s1540_s2] sm:$0xf] }
  0x4e   :  { %v1166_v2 = vld [vmem:[#allocation8 + $0xb0] sm:$0xff]   ;;  %v1169_v5 = vld [vmem:[#allocation8 + $0x38] sm:$0xff]   ;;  %v1384_v14 = vrot.slane %v101_v11, %v105_v9  ;;  %v1386_v15 = vrot.slane %v101_v11, %v113_v10  ;;  %v1388_v16 = vrot.slane %v101_v11, %v109_v12  ;;  %v1390_v17 = vrot.slane %v101_v11, %v117_v13 }
  0x4f   :  { %294 = vmatpush1.bf16.msra.mxu0 %v1125_v23  ;;  %347 = vmatpush1.bf16.msra.mxu1 %v1126_v24  ;;  %v1170_v6 = vld [vmem:[#allocation8 + $0xb8] sm:$0xff]  }
  0x50   :  { %295 = vmatprep.subr.bf16.mxu0 %v1127_v25  ;;  %348 = vmatprep.subr.bf16.mxu1 %v1129_v26 }
  0x53   :  { %296 = vmatpush1.bf16.msra.mxu0 %v1131_v27  ;;  %349 = vmatpush1.bf16.msra.mxu1 %v1132_v28 }
  0x54   :  { %297 = vmatprep.subr.bf16.mxu0 %v1133_v29  ;;  %350 = vmatprep.subr.bf16.mxu1 %v1135_v30 }
  0x57   :  { %298 = vmatpush1.bf16.msra.mxu0 %v1137_v31  ;;  %351 = vmatpush1.bf16.msra.mxu1 %v1138_v32 }
  0x58   :  { %1024 = vmatprep.subr.bf16.mxu0 %v1139_v39  ;;  %1052 = vmatprep.subr.bf16.mxu1 %v1140_v40 }
  0x5a   :  { %316 = vmatmul.mubr.bf16.vlgmr.msra.gmra.mrb[0].mxu0 %v67_v35  ;;  %369 = vmatmul.mubr.bf16.vlgmr.msra.gmra.mrb[0].mxu1 %v67_v35 }
  0x5b   :  { %325 = vmatprep.mubr.bf16.mxu0 %v1306_v0  ;;  %378 = vmatprep.mubr.bf16.mxu1 %v1306_v0  ;;  %v1164_v0 = vld [vmem:[#allocation8 + $0xf0] sm:$0xff]  }
  0x5c   :  { %1025 = vmatpush3.bf16.msra.mxu0 %v1141_v41  ;;  %1053 = vmatpush3.bf16.msra.mxu1 %v1142_v42 }
  0x5d   :  { %1026 = vmatprep.subr.bf16.mxu0 %v1143_v43  ;;  %1054 = vmatprep.subr.bf16.mxu1 %v1144_v44 }
  0x60   :  { %1027 = vmatpush3.bf16.msra.mxu0 %v1145_v45  ;;  %1055 = vmatpush3.bf16.msra.mxu1 %v1146_v46 }
  0x61   :  { %1028 = vmatprep.subr.bf16.mxu0 %v1147_v47  ;;  %1056 = vmatprep.subr.bf16.mxu1 %v1148_v48 }
  0x62   :  { %326 = vmatmul.mubr.bf16.gmra.mrb[4].mxu0 %v68_v38  ;;  %379 = vmatmul.mubr.bf16.gmra.mrb[4].mxu1 %v68_v38 }
  0x64   :  { %1029 = vmatpush3.bf16.msra.mxu0 %v1149_v49  ;;  %1057 = vmatpush3.bf16.msra.mxu1 %v1150_v50 }
  0x65   :  { %1030 = vmatprep.subr.bf16.mxu0 %v1151_v51  ;;  %1058 = vmatprep.subr.bf16.mxu1 %v1152_v52 }
  0x68   :  { %1031 = vmatpush3.bf16.msra.mxu0 %v1153_v53  ;;  %1059 = vmatpush3.bf16.msra.mxu1 %v1154_v54 }
  0x69   :  { %1032 = vmatprep.subr.bf16.mxu0 %v1155_v55  ;;  %1060 = vmatprep.subr.bf16.mxu1 %v1156_v56 }
  0x6c   :  { %1033 = vmatpush3.bf16.msra.mxu0 %v1157_v57  ;;  %1061 = vmatpush3.bf16.msra.mxu1 %v1158_v58 }
  0x6d   :  { %1034 = vmatprep.subr.bf16.mxu0 %v1159_v59  ;;  %1062 = vmatprep.subr.bf16.mxu1 %v1160_v60 }
  0x70   :  { %1035 = vmatpush3.bf16.msra.mxu0 %v1161_v61  ;;  %1063 = vmatpush3.bf16.msra.mxu1 %v1162_v62 }
  0x71   :  { %1036 = vmatprep.subr.bf16.mxu0 %v1163_v63  ;;  %1064 = vmatprep.subr.bf16.mxu1 %v1164_v0 }
  0x74   :  { %1037 = vmatpush3.bf16.msra.mxu0 %v1165_v1  ;;  %1065 = vmatpush3.bf16.msra.mxu1 %v1166_v2 }
  0x75   :  { %1038 = vmatprep.subr.bf16.mxu0 %v1167_v3  ;;  %1066 = vmatprep.subr.bf16.mxu1 %v1168_v4 }
  0x78   :  { %1039 = vmatpush3.bf16.msra.mxu0 %v1169_v5  ;;  %1067 = vmatpush3.bf16.msra.mxu1 %v1170_v6 }
 0x12d   :  { %v317_v18 = vpop.f32.mrb[0].mxu0  ;;  %v370_v19 = vpop.f32.mrb[0].mxu1 }
 0x12e   :  { %v1393_v20 = vadd.f32 %v317_v18, %v1384_v14  ;;  %v1396_v21 = vadd.f32 %v370_v19, %v1386_v15  ;;  %v319_v22 = vpop.f32.mrb[1].mxu0  ;;  %v372_v23 = vpop.f32.mrb[1].mxu1 }
 0x12f   :  { %v1399_v24 = vadd.f32 %v319_v22, %v1388_v16  ;;  %v1402_v25 = vadd.f32 %v372_v23, %v1390_v17  ;;  %v321_v26 = vpop.f32.mrb[2].mxu0  ;;  %v374_v27 = vpop.f32.mrb[2].mxu1 }
 0x130   :  { %v389_v28 = vmul.f32 %v1393_v20, %v1393_v20  ;;  %v391_v29 = vmul.f32 %v1396_v21, %v1396_v21  ;;  %v1409_v30 = vadd.f32 %v321_v26, %v1384_v14  ;;  %v1412_v31 = vadd.f32 %v374_v27, %v1386_v15  ;;  %v323_v32 = vpop.f32.mrb[3].mxu0  ;;  %v376_v33 = vpop.f32.mrb[3].mxu1 }
 0x131   :  { %v390_v34 = vmul.f32 %v1399_v24, %v1399_v24  ;;  %v392_v35 = vmul.f32 %v1402_v25, %v1402_v25  ;;  %v1419_v36 = vadd.f32 %v323_v32, %v1388_v16  ;;  %v1422_v37 = vadd.f32 %v376_v33, %v1390_v17 }
 0x132   :  { %v405_v38 = vmul.f32 %v389_v28, %v1393_v20  ;;  %v407_v39 = vmul.f32 %v391_v29, %v1396_v21  ;;  %v393_v40 = vmul.f32 %v1409_v30, %v1409_v30  ;;  %v395_v41 = vmul.f32 %v1412_v31, %v1412_v31 }
 0x133   :  { %v406_v42 = vmul.f32 %v390_v34, %v1399_v24  ;;  %v408_v43 = vmul.f32 %v392_v35, %v1402_v25  ;;  %v394_v44 = vmul.f32 %v1419_v36, %v1419_v36  ;;  %v396_v45 = vmul.f32 %v1422_v37, %v1422_v37 }
 0x134   :  { %v421_v46 = vmul.f32 0.044715, %v405_v38  ;;  %v423_v47 = vmul.f32 0.044715, %v407_v39  ;;  %v409_v48 = vmul.f32 %v393_v40, %v1409_v30  ;;  %v411_v49 = vmul.f32 %v395_v41, %v1412_v31 }
 0x135   :  { %v422_v50 = vmul.f32 0.044715, %v406_v42  ;;  %v424_v51 = vmul.f32 0.044715, %v408_v43  ;;  %v410_v52 = vmul.f32 %v394_v44, %v1419_v36  ;;  %v412_v53 = vmul.f32 %v396_v45, %v1422_v37  ;;  %v327_v54 = vpop.f32.mrb[4].mxu0  ;;  %v380_v55 = vpop.f32.mrb[4].mxu1 }
 0x136   :  { %v437_v56 = vadd.f32 %v421_v46, %v1393_v20  ;;  %v439_v57 = vadd.f32 %v423_v47, %v1396_v21  ;;  %v425_v58 = vmul.f32 0.044715, %v409_v48  ;;  %v427_v59 = vmul.f32 0.044715, %v411_v49  ;;  %v329_v60 = vpop.f32.mrb[5].mxu0  ;;  %v382_v61 = vpop.f32.mrb[5].mxu1 }
 0x137   :  { %v438_v62 = vadd.f32 %v422_v50, %v1399_v24  ;;  %v440_v63 = vadd.f32 %v424_v51, %v1402_v25  ;;  %v426_v0 = vmul.f32 0.044715, %v410_v52  ;;  %v428_v1 = vmul.f32 0.044715, %v412_v53  ;;  %v331_v2 = vpop.f32.mrb[6].mxu0  ;;  %v384_v3 = vpop.f32.mrb[6].mxu1 }
 0x138   :  { %v453_v4 = vmul.f32 0.7978846, %v437_v56  ;;  %v455_v5 = vmul.f32 0.7978846, %v439_v57  ;;  %v441_v6 = vadd.f32 %v425_v58, %v1409_v30  ;;  %v443_v7 = vadd.f32 %v427_v59, %v1412_v31  ;;  %v333_v8 = vpop.f32.mrb[7].mxu0  ;;  %v386_v9 = vpop.f32.mrb[7].mxu1 }
 0x139   :  { %v454_v10 = vmul.f32 0.7978846, %v438_v62  ;;  %v456_v11 = vmul.f32 0.7978846, %v440_v63  ;;  %v442_v12 = vadd.f32 %v426_v0, %v1419_v36  ;;  %v444_v13 = vadd.f32 %v428_v1, %v1422_v37 }
 0x13a   :  { %1171 = vtanh.f32 %v453_v4  ;;  %v457_v18 = vmul.f32 0.7978846, %v441_v6  ;;  %v459_v19 = vmul.f32 0.7978846, %v443_v7  ;;  %v1449_v22 = vadd.f32 %v327_v54, %v1384_v14 }
 0x13b   :  { %1173 = vtanh.f32 %v455_v5  ;;  %v458_v23 = vmul.f32 0.7978846, %v442_v12  ;;  %v460_v26 = vmul.f32 0.7978846, %v444_v13  ;;  %v1452_v27 = vadd.f32 %v380_v55, %v1386_v15 }
 0x13c   :  { %1175 = vtanh.f32 %v454_v10  ;;  %v397_v28 = vmul.f32 %v1449_v22, %v1449_v22  ;;  %v1457_v29 = vadd.f32 %v329_v60, %v1388_v16  ;;  %v1460_v32 = vadd.f32 %v382_v61, %v1390_v17 }
 0x13d   :  { %1177 = vtanh.f32 %v456_v11  ;;  %v399_v33 = vmul.f32 %v1452_v27, %v1452_v27  ;;  %v1465_v34 = vadd.f32 %v331_v2, %v1384_v14  ;;  %v1468_v35 = vadd.f32 %v384_v3, %v1386_v15 }
 0x13e   :  { %1179 = vtanh.f32 %v457_v18  ;;  %v413_v38 = vmul.f32 %v397_v28, %v1449_v22  ;;  %v398_v39 = vmul.f32 %v1457_v29, %v1457_v29  ;;  %v400_v40 = vmul.f32 %v1460_v32, %v1460_v32 }
 0x13f   :  { %1181 = vtanh.f32 %v459_v19  ;;  %v415_v41 = vmul.f32 %v399_v33, %v1452_v27  ;;  %v401_v42 = vmul.f32 %v1465_v34, %v1465_v34  ;;  %v403_v14 = vmul.f32 %v1468_v35, %v1468_v35 }
 0x140   :  { %1183 = vtanh.f32 %v458_v23  ;;  %v429_v15 = vmul.f32 0.044715, %v413_v38  ;;  %v414_v43 = vmul.f32 %v398_v39, %v1457_v29  ;;  %v416_v44 = vmul.f32 %v400_v40, %v1460_v32 }
 0x141   :  { %1185 = vtanh.f32 %v460_v26  ;;  %v431_v45 = vmul.f32 0.044715, %v415_v41  ;;  %v417_v46 = vmul.f32 %v401_v42, %v1465_v34  ;;  %v419_v47 = vmul.f32 %v403_v14, %v1468_v35 }
 0x142   :  { %v445_v48 = vadd.f32 %v429_v15, %v1449_v22  ;;  %v430_v49 = vmul.f32 0.044715, %v414_v43  ;;  %v432_v50 = vmul.f32 0.044715, %v416_v44  ;;  %v1486_v51 = vadd.f32 %v333_v8, %v1388_v16 }
 0x143   :  { %v447_v52 = vadd.f32 %v431_v45, %v1452_v27  ;;  %v433_v53 = vmul.f32 0.044715, %v417_v46  ;;  %v435_v54 = vmul.f32 0.044715, %v419_v47  ;;  %v1490_v55 = vadd.f32 %v386_v9, %v1390_v17 }
 0x144   :  { %v1172_v56 = vpop.eup %1171  ;;  %v461_v57 = vmul.f32 0.7978846, %v445_v48  ;;  %v446_v58 = vadd.f32 %v430_v49, %v1457_v29  ;;  %v448_v59 = vadd.f32 %v432_v50, %v1460_v32  ;;  %v402_v60 = vmul.f32 %v1486_v51, %v1486_v51 }
 0x145   :  { %v1174_v61 = vpop.eup %1173  ;;  %v485_v62 = vadd.f32 1.0, %v1172_v56  ;;  %v463_v16 = vmul.f32 0.7978846, %v447_v52  ;;  %v449_v63 = vadd.f32 %v433_v53, %v1465_v34  ;;  %v451_v0 = vadd.f32 %v435_v54, %v1468_v35 }
 0x146   :  { %v1176_v1 = vpop.eup %1175  ;;  %v487_v2 = vadd.f32 1.0, %v1174_v61  ;;  %1187 = vtanh.f32 %v461_v57  ;;  %v462_v17 = vmul.f32 0.7978846, %v446_v58  ;;  %v464_v3 = vmul.f32 0.7978846, %v448_v59 }
 0x147   :  { %v1178_v4 = vpop.eup %1177  ;;  %v501_v5 = vmul.f32 0.5, %v485_v62  ;;  %1189 = vtanh.f32 %v463_v16  ;;  %v465_v6 = vmul.f32 0.7978846, %v449_v63  ;;  %v467_v7 = vmul.f32 0.7978846, %v451_v0 }
 0x148   :  { %v1180_v8 = vpop.eup %1179  ;;  %v503_v9 = vmul.f32 0.5, %v487_v2  ;;  %1191 = vtanh.f32 %v462_v17  ;;  %v418_v10 = vmul.f32 %v402_v60, %v1486_v51  ;;  %v404_v11 = vmul.f32 %v1490_v55, %v1490_v55 }
 0x149   :  { %v1182_v12 = vpop.eup %1181  ;;  %v517_v13 = vmul.f32 %v501_v5, %v1393_v20  ;;  %v489_v18 = vadd.f32 1.0, %v1180_v8  ;;  %1193 = vtanh.f32 %v464_v3  ;;  %v486_v19 = vadd.f32 1.0, %v1176_v1 }
 0x14a   :  { %v1184_v23 = vpop.eup %1183  ;;  %v519_v26 = vmul.f32 %v503_v9, %v1396_v21  ;;  %v491_v28 = vadd.f32 1.0, %v1182_v12  ;;  %1195 = vtanh.f32 %v465_v6  ;;  %v434_v33 = vmul.f32 0.044715, %v418_v10 }
 0x14b   :  { %v1186_v38 = vpop.eup %1185  ;;  %v505_v39 = vmul.f32 0.5, %v489_v18  ;;  %1197 = vtanh.f32 %v467_v7  ;;  %v420_v40 = vmul.f32 %v404_v11, %v1490_v55  ;;  %v490_v41 = vadd.f32 1.0, %v1184_v23 }
 0x14c   :  { %v507_v42 = vmul.f32 0.5, %v491_v28  ;;  %v450_v14 = vadd.f32 %v434_v33, %v1486_v51  ;;  %v502_v15 = vmul.f32 0.5, %v486_v19  ;;  %v488_v20 = vadd.f32 1.0, %v1178_v4 }
 0x14d   :  { %v521_v43 = vmul.f32 %v505_v39, %v1409_v30  ;;  %v436_v44 = vmul.f32 0.044715, %v420_v40  ;;  %v506_v45 = vmul.f32 0.5, %v490_v41  ;;  %v492_v46 = vadd.f32 1.0, %v1186_v38 }
 0x14e   :  { %v523_v21 = vmul.f32 %v507_v42, %v1412_v31  ;;  %v466_v47 = vmul.f32 0.7978846, %v450_v14  ;;  %v518_v48 = vmul.f32 %v502_v15, %v1399_v24  ;;  %v504_v49 = vmul.f32 0.5, %v488_v20 }
 0x14f   :  { %v533_v50 = vpack.c.bf16 %v521_v43, %v517_v13  ;;  %v452_v52 = vadd.f32 %v436_v44, %v1490_v55  ;;  %v522_v53 = vmul.f32 %v506_v45, %v1419_v36  ;;  %v508_v54 = vmul.f32 0.5, %v492_v46 }
 0x150   :  { %v1188_v56 = vpop.eup %1187  ;;  %v535_v57 = vpack.c.bf16 %v523_v21, %v519_v26  ;;  %1199 = vtanh.f32 %v466_v47  ;;  %v520_v30 = vmul.f32 %v504_v49, %v1402_v25 }
 0x151   :  { %v1190_v58 = vpop.eup %1189  ;;  %v468_v59 = vmul.f32 0.7978846, %v452_v52  ;;  %v534_v60 = vpack.c.bf16 %v522_v53, %v518_v48  ;;  %v524_v31 = vmul.f32 %v508_v54, %v1422_v37  ;;  %v493_v61 = vadd.f32 1.0, %v1188_v56 }
 0x152   :  { %v1192_v62 = vpop.eup %1191  ;;  %v495_v24 = vadd.f32 1.0, %v1190_v58 }
 0x153   :  { %v1194_v16 = vpop.eup %1193  ;;  %1201 = vtanh.f32 %v468_v59  ;;  %829 = vmatprep.mubr.bf16.mxu0 %v534_v60  ;;  %v536_v63 = vpack.c.bf16 %v524_v31, %v520_v30  ;;  %v509_v2 = vmul.f32 0.5, %v493_v61  ;;  %v494_v3 = vadd.f32 1.0, %v1192_v62 }
 0x154   :  { %v1196_v0 = vpop.eup %1195  ;;  %830 = vmatmul.mubr.bf16.vlgmr.msra.gmra.mrb[8].mxu0 %v533_v50  ;;  %v511_v17 = vmul.f32 0.5, %v495_v24  ;;  %v496_v8 = vadd.f32 1.0, %v1194_v16 }
 0x155   :  { %v1198_v36 = vpop.eup %1197  ;;  %878 = vmatprep.mubr.bf16.mxu1 %v536_v63  ;;  %v497_v1 = vadd.f32 1.0, %v1196_v0  ;;  %v525_v37 = vmul.f32 %v509_v2, %v1449_v22  ;;  %v510_v12 = vmul.f32 0.5, %v494_v3 }
 0x156   :  { %879 = vmatmul.mubr.bf16.vlgmr.msra.gmra.mrb[8].mxu1 %v535_v57  ;;  %v499_v25 = vadd.f32 1.0, %v1198_v36  ;;  %v527_v9 = vmul.f32 %v511_v17, %v1452_v27  ;;  %v512_v28 = vmul.f32 0.5, %v496_v8 }
 0x157   :  { %v513_v4 = vmul.f32 0.5, %v497_v1  ;;  %v526_v33 = vmul.f32 %v510_v12, %v1457_v29 }
 0x158   :  { %v515_v5 = vmul.f32 0.5, %v499_v25  ;;  %v528_v39 = vmul.f32 %v512_v28, %v1460_v32  ;;  %v1023_v32 = vld [vmem:[%s1542_s4] ss:$0 sm:$0xff]  ;;  %s1307_s4 = smov [#allocation9]  }
 0x159   :  { %v529_v6 = vmul.f32 %v513_v4, %v1465_v34  ;;  %s946_s10 = sshll.u32 %s1307_s4, 4  ;;  %s947_s10 = int_to_ptr.vmem [resolvable:$true] %s946_s10 }
 0x15a   :  { %v1200_v7 = vpop.eup %1199  ;;  %v531_v10 = vmul.f32 %v515_v5, %v1468_v35  ;;  %s1269_s11 = scalar_lea.vmem %s947_s10, 512  ;;  %p1274_p11 = scmp.lt.s32.totalorder %s947_s10, %s947_s10 }
 0x15b   :  { %v498_v11 = vadd.f32 1.0, %v1200_v7  ;;  %v537_v13 = vpack.c.bf16 %v529_v6, %v525_v37  ;;  %p1270_p10 = scmp.ne.s32.totalorder %s947_s10, %s1269_s11  ;;  %p1275_p12 = scmp.lt.s32.totalorder %s1269_s11, %s1269_s11 }
 0x15c   :  { %v539_v18 = vpack.c.bf16 %v531_v10, %v527_v9 }
 0x15d   :  { %v1202_v19 = vpop.eup %1201  ;;  %v514_v23 = vmul.f32 0.5, %v498_v11  ;;  %p1276_p13 = por %p1275_p12, %p1274_p11 }
 0x15e   :  { %v500_v26 = vadd.f32 1.0, %v1202_v19 }
 0x15f   :  { %v530_v22 = vmul.f32 %v514_v23, %v1486_v51  ;;  %p1277_p0 = pnand %p1276_p13, %p1270_p10 }
 0x160   :  { %v516_v38 = vmul.f32 0.5, %v500_v26 }
 0x161   :  { %v538_v34 = vpack.c.bf16 %v530_v22, %v526_v33 }
 0x162   :  { %v532_v27 = vmul.f32 %v516_v38, %v1490_v55 }
 0x163   :  { %837 = vmatprep.mubr.bf16.mxu0 %v538_v34 }
 0x164   :  { %v540_v35 = vpack.c.bf16 %v532_v27, %v528_v39  ;;  %838 = vmatmul.mubr.bf16.gmra.mrb[12].mxu0 %v537_v13 }
 0x166   :  { %886 = vmatprep.mubr.bf16.mxu1 %v540_v35 }
 0x167   :  { %887 = vmatmul.mubr.bf16.gmra.mrb[12].mxu1 %v539_v18 }
 0x227   :  { %v1040_v40 = vpop.f32.mrb[8].mxu0 }
 0x228   :  { %v1041_v41 = vpop.f32.mrb[9].mxu0 }
 0x229   :  { %v1068_v42 = vpop.f32.mrb[8].mxu1  ;;  %v1042_v14 = vadd.f32 %v1041_v41, %v1040_v40  ;;  %v1043_v15 = vpop.f32.mrb[10].mxu0 }
 0x22a   :  { %v1069_v20 = vpop.f32.mrb[9].mxu1  ;;  %v1044_v29 = vpop.f32.mrb[11].mxu0 }
 0x22b   :  { %v1070_v43 = vadd.f32 %v1069_v20, %v1068_v42  ;;  %v1071_v51 = vpop.f32.mrb[10].mxu1  ;;  %v1045_v44 = vadd.f32 %v1044_v29, %v1043_v15 }
 0x22c   :  { %v1072_v55 = vpop.f32.mrb[11].mxu1 }
 0x22d   :  { %v881_v45 = vadd.f32 %v1070_v43, %v1042_v14  ;;  %v1073_v46 = vadd.f32 %v1072_v55, %v1071_v51 }
 0x22f   :  { %v933_v21 = vadd.f32 %v1023_v32, %v881_v45  ;;  %v884_v47 = vadd.f32 %v1073_v46, %v1045_v44 }
 0x231   :  { %937 = vst [vmem:[#allocation9] sm:$0xff] %v933_v21  ;;  %v934_v48 = vadd.f32 %v1023_v32, %v884_v47 }
 0x233   :  { %938 = vst [vmem:[#allocation9 + $0x8] sm:$0xff] %v934_v48 }
 0x237   :  { %v1046_v49 = vpop.f32.mrb[12].mxu0 }
 0x238   :  { %v1047_v50 = vpop.f32.mrb[13].mxu0 }
 0x239   :  { %v1048_v52 = vadd.f32 %v1047_v50, %v1046_v49  ;;  %v1049_v53 = vpop.f32.mrb[14].mxu0 }
 0x23a   :  { %v1074_v54 = vpop.f32.mrb[12].mxu1  ;;  %v1050_v56 = vpop.f32.mrb[15].mxu0 }
 0x23b   :  { %v1075_v57 = vpop.f32.mrb[13].mxu1  ;;  %v1051_v30 = vadd.f32 %v1050_v56, %v1049_v53 }
 0x23c   :  { %v1076_v58 = vadd.f32 %v1075_v57, %v1074_v54  ;;  %v1077_v59 = vpop.f32.mrb[14].mxu1 }
 0x23d   :  { %v1078_v60 = vpop.f32.mrb[15].mxu1 }
 0x23e   :  { %v889_v31 = vadd.f32 %v1076_v58, %v1048_v52  ;;  %v1079_v61 = vadd.f32 %v1078_v60, %v1077_v59 }
 0x240   :  { %v935_v62 = vadd.f32 %v1023_v32, %v889_v31  ;;  %v892_v24 = vadd.f32 %v1079_v61, %v1051_v30 }
 0x242   :  { %939 = vst [vmem:[#allocation9 + $0x10] sm:$0xff] %v935_v62  ;;  %v936_v16 = vadd.f32 %v1023_v32, %v892_v24 }
 0x244   :  { %940 = vst [vmem:[#allocation9 + $0x18] sm:$0xff] %v936_v16 }
 0x245   :  { %1280 = shalt.err (!%p1277_p0)
}
 0x246   :  { %s1281_s14 = scalar_lea.hbm %s1543_s5, 512 }
 0x247   :  { %p1282_p1 = scmp.ne.s32.totalorder %s1543_s5, %s1281_s14  ;;  %p1285_p2 = scmp.lt.u32.totalorder %s1281_s14, %s1543_s5 }
 0x249   :  { %p1287_p3 = pnand %p1285_p2, %p1282_p1 }
 0x24b   :  { %1290 = shalt.err (!%p1287_p3)
}
 0x24c   :  { %952 = dma.vmem_to_hbm [thread:$0]  %s947_s10, 512, %s1543_s5, [#allocation5], %s1301_s1, %s1301_s1, %s1302_s17  }
 0x24d   :  { %1295 = dma.done.wait [#allocation5], 512  }
 0x24e   :  { %1296 = vsyncadd [#allocation5], 4294966784 }
 0x24f   :  { %956 = vsyncpa [#allocation4], 1 }
 0x250   :  { %957 = vsyncpa [#allocation7], 1 }
 0x251   :  { %958 = vsyncpa [#allocation5], 1 }

</bundles_post_ra>
